<compile_context>
chip_gen: v7x
topology: tpu7x:2x2x1
jax: 0.10.0
libtpu: 0.0.40
codegen_flags: <defaults>
</compile_context>

<pallas_src>
import jax
import jax.numpy as jnp
import numpy as np
from jax import lax
from jax.experimental import pallas as pl
from jax.experimental.pallas import tpu as pltpu


# ----------------------------------------------------------------------------
# Pallas kernel: T fused steps of  one-hot-embed -> GRU step -> out proj -> log_softmax
# ----------------------------------------------------------------------------
def generator_kernel(
    ids_ref,                                   # VMEM (1, B, 1) int32  token ids, step t
    img_ref,                                   # VMEM (B, F)    f32    (resident)
    h0_ref,                                    # VMEM (1, B, H) f32    initial hidden (resident)
    g_ref,                                     # VMEM (O, 4H)   f32    folded emb->gate table (resident)
    wimg_ref,                                  # VMEM (F, 4H)   f32    folded img->gate weights (resident)
    wh_ref,                                    # VMEM (H, 4H)   f32    hidden->gate weights (resident)
    bgru_ref,                                  # VMEM (1, 4H)   f32    fused gate bias (resident)
    wout_ref,                                  # VMEM (H, O)    f32    output projection (resident)
    bout_ref,                                  # VMEM (1, O)    f32
    out_ref,                                   # VMEM (1, B, O) f32    per-step log-probs
    hlast_ref,                                 # VMEM (B, H)    f32    final hidden (written on last step)
    hsc_ref,                                   # scratch VMEM (B, H) f32  carried hidden
):
    t = pl.program_id(0)
    B, H = hsc_ref.shape
    O = g_ref.shape[0]

    # Initialize the carried hidden state from the kernel input on the first step.
    @pl.when(t == 0)
    def _():
        hsc_ref[...] = h0_ref[0]

    h = hsc_ref[...]                                              # (B, H)

    # --- Embedding gather as a one-hot MXU dot (no scalar/serial gather) -----
    ids = ids_ref[0]                                              # (B, 1) int32
    one_hot = (lax.broadcasted_iota(jnp.int32, (B, O), 1) == ids).astype(jnp.float32)

    # pre = [r_pre | z_pre | i_n | h_n]   (B, 4H); 4H == 128 lanes (dense)
    pre = (
        jnp.dot(one_hot, g_ref[...], preferred_element_type=jnp.float32)
        + jnp.dot(img_ref[...], wimg_ref[...], preferred_element_type=jnp.float32)
        + jnp.dot(h, wh_ref[...], preferred_element_type=jnp.float32)
        + bgru_ref[...]
    )

    # GRU cell (PyTorch gate ordering r, z, n); both sigmoids in one EUP call.
    sig = jax.nn.sigmoid(pre[:, : 2 * H])
    r = sig[:, :H]
    z = sig[:, H:]
    n = jnp.tanh(pre[:, 2 * H : 3 * H] + r * pre[:, 3 * H : 4 * H])
    h_new = (1.0 - z) * n + z * h                                 # (B, H)

    # Output projection + numerically stable log_softmax (O = 128 lanes, dense).
    logits = jnp.dot(h_new, wout_ref[...], preferred_element_type=jnp.float32) + bout_ref[...]
    m = jnp.max(logits, axis=-1, keepdims=True)
    lse = m + jnp.log(jnp.sum(jnp.exp(logits - m), axis=-1, keepdims=True))
    out_ref[0] = logits - lse

    # Carry hidden to the next step; emit the final hidden only once.
    hsc_ref[...] = h_new

    @pl.when(t == pl.num_programs(0) - 1)
    def _():
        hlast_ref[...] = h_new


# ----------------------------------------------------------------------------
# Wrapper: one pallas_call for T decode steps; weights resident across the grid.
# ----------------------------------------------------------------------------
@jax.jit
def generator_forward(packed, token_seq, img_feat, hidden):
    """token_seq: (T, B) int32; img_feat: (B, F) f32; hidden: (1, B, H) f32.

    Returns (out, h_last): out (T, B, O) per-step log-probs, h_last (1, B, H).
    Equivalent to T sequential calls of Generator.forward (eval mode).
    """
    T, B = token_seq.shape
    F = img_feat.shape[1]
    H = packed["w_h"].shape[0]
    O = packed["w_out"].shape[1]

    ids = token_seq.reshape(T, B, 1).astype(jnp.int32)

    out, h_last = pl.pallas_call(
        generator_kernel,
        out_shape=(
            jax.ShapeDtypeStruct((T, B, O), jnp.float32),
            jax.ShapeDtypeStruct((B, H), jnp.float32),
        ),
        grid_spec=pltpu.PrefetchScalarGridSpec(
            num_scalar_prefetch=0,
            grid=(T,),
            in_specs=[
                pl.BlockSpec((1, B, 1), lambda t: (t, 0, 0)),      # token ids (per step)
                pl.BlockSpec((B, F), lambda t: (0, 0)),            # img_feat (resident)
                pl.BlockSpec((1, B, H), lambda t: (0, 0, 0)),      # initial hidden (resident)
                pl.BlockSpec((O, 4 * H), lambda t: (0, 0)),        # g_emb (resident)
                pl.BlockSpec((F, 4 * H), lambda t: (0, 0)),        # w_img (resident)
                pl.BlockSpec((H, 4 * H), lambda t: (0, 0)),        # w_h (resident)
                pl.BlockSpec((1, 4 * H), lambda t: (0, 0)),        # b_gru (resident)
                pl.BlockSpec((H, O), lambda t: (0, 0)),            # w_out (resident)
                pl.BlockSpec((1, O), lambda t: (0, 0)),            # b_out (resident)
            ],
            out_specs=(
                pl.BlockSpec((1, B, O), lambda t: (t, 0, 0)),      # per-step log-probs
                pl.BlockSpec((B, H), lambda t: (0, 0)),            # final hidden
            ),
            scratch_shapes=[pltpu.VMEM((B, H), jnp.float32)],      # carried hidden
        ),
        compiler_params=pltpu.CompilerParams(
            dimension_semantics=("arbitrary",)),                   # hidden carries step->step
    )(
        ids, img_feat, hidden,
        packed["g_emb"], packed["w_img"], packed["w_h"], packed["b_gru"],
        packed["w_out"], packed["b_out"],
    )
    return out, h_last.reshape(1, B, H)


# ----------------------------------------------------------------------------
# Deterministic canonical parameters (matches nn.Module __init__ shapes)
# ----------------------------------------------------------------------------
def make_params(key, img_feat_size, hidden_size, output_size):
    ks = jax.random.split(key, 8)
    H, F, O = hidden_size, img_feat_size, output_size
    s = 0.1

    emb = s * jax.random.normal(ks[0], (O, H), jnp.float32)            # Embedding(O, H)

    # nn.Linear(F + H, H): weight (H, F+H) -> pre-transposed/split to [in, out].
    w_lin = s * jax.random.normal(ks[1], (F + H, H), jnp.float32)
    b_lin = s * jax.random.normal(ks[2], (1, H), jnp.float32)

    # nn.GRU(H, H, 1 layer): weight_ih_l0 (3H, H), weight_hh_l0 (3H, H), gates (r, z, n).
    w_ih = s * jax.random.normal(ks[3], (3 * H, H), jnp.float32)
    w_hh = s * jax.random.normal(ks[4], (3 * H, H), jnp.float32)
    b_ih = s * jax.random.normal(ks[5], (3 * H,), jnp.float32)
    b_hh = s * jax.random.normal(ks[6], (3 * H,), jnp.float32)

    # nn.Linear(H, O)
    w_out = s * jax.random.normal(ks[7], (H, O), jnp.float32)
    b_out = jnp.zeros((1, O), jnp.float32)

    return {
        "emb": emb,
        "w_lin_e": w_lin[:H, :], "w_lin_i": w_lin[H:, :], "b_lin": b_lin,
        "w_ir": w_ih[0 * H:1 * H].T, "w_iz": w_ih[1 * H:2 * H].T, "w_in": w_ih[2 * H:3 * H].T,
        "b_ir": b_ih[0 * H:1 * H][None], "b_iz": b_ih[1 * H:2 * H][None], "b_in": b_ih[2 * H:3 * H][None],
        "w_hr": w_hh[0 * H:1 * H].T, "w_hz": w_hh[1 * H:2 * H].T, "w_hn": w_hh[2 * H:3 * H].T,
        "b_hr": b_hh[0 * H:1 * H][None], "b_hz": b_hh[1 * H:2 * H][None], "b_hn": b_hh[2 * H:3 * H][None],
        "w_out": w_out, "b_out": b_out,
    }


# ----------------------------------------------------------------------------
# Constant folding (once, off the hot path, full-precision numpy f32), with the
# gate layout  [r | z | i_n | h_n]  along the 4H axis:
#   G      = [emb @ w_le @ [w_ir|w_iz|w_in] | 0]              (O,   4H)
#   W_img  = [w_li @ [w_ir|w_iz|w_in]       | 0]              (F,   4H)
#   W_h    = [w_hr | w_hz | 0 | w_hn]                         (H,   4H)
#   b_gru  = [b_ir+b_hr+b_lin@w_ir | b_iz+b_hz+b_lin@w_iz |
#             b_in+b_lin@w_in      | b_hn]                    (1,   4H)
# (Folding b_lin / the first Linear into the gates is valid: no nonlinearity
#  between the Linear and the GRU input transform, dropout == identity.)
# ----------------------------------------------------------------------------
def pack_params(p, img_feat_size, hidden_size, output_size):
    H, F, O = hidden_size, img_feat_size, output_size
    f32 = np.float32

    emb = np.asarray(p["emb"], f32)
    w_le = np.asarray(p["w_lin_e"], f32)
    w_li = np.asarray(p["w_lin_i"], f32)
    b_lin = np.asarray(p["b_lin"], f32)
    w_i3 = np.concatenate(
        [np.asarray(p["w_ir"]), np.asarray(p["w_iz"]), np.asarray(p["w_in"])], axis=1
    ).astype(f32)                                                  # (H, 3H)

    g_emb = np.zeros((O, 4 * H), f32)
    g_emb[:, :3 * H] = (emb @ w_le) @ w_i3

    w_img = np.zeros((F, 4 * H), f32)
    w_img[:, :3 * H] = w_li @ w_i3

    w_h = np.zeros((H, 4 * H), f32)
    w_h[:, 0 * H:1 * H] = np.asarray(p["w_hr"], f32)
    w_h[:, 1 * H:2 * H] = np.asarray(p["w_hz"], f32)
    w_h[:, 3 * H:4 * H] = np.asarray(p["w_hn"], f32)

    b_lin_g = b_lin @ w_i3                                         # (1, 3H)
    b_gru = np.zeros((1, 4 * H), f32)
    b_gru[:, 0 * H:1 * H] = np.asarray(p["b_ir"], f32) + np.asarray(p["b_hr"], f32) + b_lin_g[:, 0 * H:1 * H]
    b_gru[:, 1 * H:2 * H] = np.asarray(p["b_iz"], f32) + np.asarray(p["b_hz"], f32) + b_lin_g[:, 1 * H:2 * H]
    b_gru[:, 2 * H:3 * H] = np.asarray(p["b_in"], f32) + b_lin_g[:, 2 * H:3 * H]
    b_gru[:, 3 * H:4 * H] = np.asarray(p["b_hn"], f32)

    return {
        "g_emb": jnp.asarray(g_emb),
        "w_img": jnp.asarray(w_img),
        "w_h": jnp.asarray(w_h),
        "b_gru": jnp.asarray(b_gru),
        "w_out": p["w_out"],
        "b_out": p["b_out"],
    }


# Pure-JAX single-step reference on the canonical (unfolded) parameters.
def reference_forward(params, token_ids, img_feat, hidden):
    hp = jax.lax.Precision.HIGHEST
    dot = lambda a, b: jnp.dot(a, b, precision=hp)
    emb = jnp.take(params["emb"], token_ids[:, 0], axis=0)
    h = hidden[0]
    x = dot(emb, params["w_lin_e"]) + dot(img_feat, params["w_lin_i"]) + params["b_lin"]
    r = jax.nn.sigmoid(dot(x, params["w_ir"]) + params["b_ir"] + dot(h, params["w_hr"]) + params["b_hr"])
    z = jax.nn.sigmoid(dot(x, params["w_iz"]) + params["b_iz"] + dot(h, params["w_hz"]) + params["b_hz"])
    n = jnp.tanh(dot(x, params["w_in"]) + params["b_in"] + r * (dot(h, params["w_hn"]) + params["b_hn"]))
    h_new = (1.0 - z) * n + z * h
    logits = dot(h_new, params["w_out"]) + params["b_out"]
    return jax.nn.log_softmax(logits, axis=-1), h_new[None]


def reference_rollout(params, token_seq, img_feat, hidden):
    outs = []
    h = hidden
    for t in range(token_seq.shape[0]):
        o, h = reference_forward(params, token_seq[t][:, None], img_feat, h)
        outs.append(o)
    return jnp.stack(outs, axis=0), h


if __name__ == "__main__":
    # Small shapes consistent with the module (4H == O == 128 is coincidental).
    B, IMG_FEAT, HIDDEN, OUTPUT, T = 2, 64, 32, 128, 4

    key = jax.random.PRNGKey(0)
    kp, ki, kt, kh = jax.random.split(key, 4)

    params = make_params(kp, IMG_FEAT, HIDDEN, OUTPUT)
    packed = pack_params(params, IMG_FEAT, HIDDEN, OUTPUT)

    token_seq = jax.random.randint(kt, (T, B), 0, OUTPUT, dtype=jnp.int32)
    img_feat = jax.random.normal(ki, (B, IMG_FEAT), jnp.float32)
    hidden0 = 0.1 * jax.random.normal(kh, (1, B, HIDDEN), jnp.float32)

    # Reference: T sequential calls of the module forward (teacher forcing).
    out_ref_v, h_ref_v = reference_rollout(params, token_seq, img_feat, hidden0)

    out, h_last = generator_forward(packed, token_seq, img_feat, hidden0)
    jax.block_until_ready((out, h_last))

    np.testing.assert_allclose(np.asarray(out), np.asarray(out_ref_v), rtol=1e-5, atol=5e-5)
    np.testing.assert_allclose(np.asarray(h_last), np.asarray(h_ref_v), rtol=1e-5, atol=5e-5)

    assert out.shape == (T, B, OUTPUT) and h_last.shape == (1, B, HIDDEN)
    print("KERNEL_OK")
</pallas_src>

<mosaic_0001>
module attributes {stable_mosaic.version = 11 : i64} {
  func.func @generator_kernel(%arg0: i32, %arg1: memref<1x2x1xi32, #tpu.memory_space<vmem>>, %arg2: memref<2x64xf32, #tpu.memory_space<vmem>>, %arg3: memref<1x2x32xf32, #tpu.memory_space<vmem>>, %arg4: memref<128x128xf32, #tpu.memory_space<vmem>>, %arg5: memref<64x128xf32, #tpu.memory_space<vmem>>, %arg6: memref<32x128xf32, #tpu.memory_space<vmem>>, %arg7: memref<1x128xf32, #tpu.memory_space<vmem>>, %arg8: memref<32x128xf32, #tpu.memory_space<vmem>>, %arg9: memref<1x128xf32, #tpu.memory_space<vmem>>, %arg10: memref<1x2x128xf32, #tpu.memory_space<vmem>>, %arg11: memref<2x32xf32, #tpu.memory_space<vmem>>, %arg12: memref<2x32xf32, #tpu.memory_space<vmem>>) attributes {dimension_semantics = [#tpu.dimension_semantics<arbitrary>], iteration_bounds = array<i64: 4>, scalar_prefetch = 0 : i64, scratch_operands = 1 : i64, tpu.core_type = #tpu.core_type<tc>, window_params = [{transform_indices = @transform_0, window_bounds = array<i64: 1, 2, 1>}, {pipeline_mode = #tpu.pipeline_mode<synchronous>, transform_indices = @transform_1, window_bounds = array<i64: 2, 64>}, {pipeline_mode = #tpu.pipeline_mode<synchronous>, transform_indices = @transform_2, window_bounds = array<i64: 1, 2, 32>}, {pipeline_mode = #tpu.pipeline_mode<synchronous>, transform_indices = @transform_3, window_bounds = array<i64: 128, 128>}, {pipeline_mode = #tpu.pipeline_mode<synchronous>, transform_indices = @transform_4, window_bounds = array<i64: 64, 128>}, {pipeline_mode = #tpu.pipeline_mode<synchronous>, transform_indices = @transform_5, window_bounds = array<i64: 32, 128>}, {pipeline_mode = #tpu.pipeline_mode<synchronous>, transform_indices = @transform_6, window_bounds = array<i64: 1, 128>}, {pipeline_mode = #tpu.pipeline_mode<synchronous>, transform_indices = @transform_7, window_bounds = array<i64: 32, 128>}, {pipeline_mode = #tpu.pipeline_mode<synchronous>, transform_indices = @transform_8, window_bounds = array<i64: 1, 128>}, {transform_indices = @transform_9, window_bounds = array<i64: 1, 2, 128>}, {pipeline_mode = #tpu.pipeline_mode<synchronous>, transform_indices = @transform_10, window_bounds = array<i64: 2, 32>}]} {
    %c0_i32 = arith.constant 0 : i32
    %0 = arith.cmpi eq, %arg0, %c0_i32 : i32
    %1 = arith.extui %0 : i1 to i32
    %c0_i32_0 = arith.constant 0 : i32
    %2 = arith.cmpi ne, %1, %c0_i32_0 : i32
    scf.if %2 {
      %c0_32 = arith.constant 0 : index
      %c0_33 = arith.constant 0 : index
      %c0_34 = arith.constant 0 : index
      %64 = vector.load %arg3[%c0_32, %c0_33, %c0_34] : memref<1x2x32xf32, #tpu.memory_space<vmem>>, vector<1x2x32xf32>
      %65 = vector.shape_cast %64 : vector<1x2x32xf32> to vector<2x32xf32>
      %c0_35 = arith.constant 0 : index
      %c0_36 = arith.constant 0 : index
      %66 = vector.load %arg12[%c0_35, %c0_36] : memref<2x32xf32, #tpu.memory_space<vmem>>, vector<2x32xf32>
      tpu.vector_store %arg12[%c0_35, %c0_36], %65 {strides = array<i32>} : memref<2x32xf32, #tpu.memory_space<vmem>>, vector<2x32xf32>,
    } else {
    }
    %c0 = arith.constant 0 : index
    %c0_1 = arith.constant 0 : index
    %3 = vector.load %arg12[%c0, %c0_1] : memref<2x32xf32, #tpu.memory_space<vmem>>, vector<2x32xf32>
    %c0_2 = arith.constant 0 : index
    %c0_3 = arith.constant 0 : index
    %c0_4 = arith.constant 0 : index
    %4 = vector.load %arg1[%c0_2, %c0_3, %c0_4] : memref<1x2x1xi32, #tpu.memory_space<vmem>>, vector<1x2x1xi32>
    %5 = vector.shape_cast %4 : vector<1x2x1xi32> to vector<2x1xi32>
    %6 = tpu.iota {dimensions = array<i32: 1>} : vector<2x128xi32>
    %7 = vector.broadcast %5 : vector<2x1xi32> to vector<2x128xi32>
    %8 = arith.cmpi eq, %6, %7 : vector<2x128xi32>
    %9 = arith.extui %8 : vector<2x128xi1> to vector<2x128xi32>
    %10 = arith.sitofp %9 : vector<2x128xi32> to vector<2x128xf32>
    %c0_5 = arith.constant 0 : index
    %c0_6 = arith.constant 0 : index
    %11 = vector.load %arg4[%c0_5, %c0_6] : memref<128x128xf32, #tpu.memory_space<vmem>>, vector<128x128xf32>
    %cst = arith.constant dense<0.000000e+00> : vector<2x128xf32>
    %12 = tpu.matmul %10, %11, %cst {dimension_numbers = #tpu.dot_dimension_numbers<[1], [0], [0], [1], [0, 0, 1, 1], [], []>} : vector<2x128xf32>, vector<128x128xf32>, vector<2x128xf32> -> vector<2x128xf32>
    %c0_7 = arith.constant 0 : index
    %c0_8 = arith.constant 0 : index
    %13 = vector.load %arg2[%c0_7, %c0_8] : memref<2x64xf32, #tpu.memory_space<vmem>>, vector<2x64xf32>
    %c0_9 = arith.constant 0 : index
    %c0_10 = arith.constant 0 : index
    %14 = vector.load %arg5[%c0_9, %c0_10] : memref<64x128xf32, #tpu.memory_space<vmem>>, vector<64x128xf32>
    %cst_11 = arith.constant dense<0.000000e+00> : vector<2x128xf32>
    %15 = tpu.matmul %13, %14, %cst_11 {dimension_numbers = #tpu.dot_dimension_numbers<[1], [0], [0], [1], [0, 0, 1, 1], [], []>} : vector<2x64xf32>, vector<64x128xf32>, vector<2x128xf32> -> vector<2x128xf32>
    %16 = arith.addf %12, %15 : vector<2x128xf32>
    %c0_12 = arith.constant 0 : index
    %c0_13 = arith.constant 0 : index
    %17 = vector.load %arg6[%c0_12, %c0_13] : memref<32x128xf32, #tpu.memory_space<vmem>>, vector<32x128xf32>
    %cst_14 = arith.constant dense<0.000000e+00> : vector<2x128xf32>
    %18 = tpu.matmul %3, %17, %cst_14 {dimension_numbers = #tpu.dot_dimension_numbers<[1], [0], [0], [1], [0, 0, 1, 1], [], []>} : vector<2x32xf32>, vector<32x128xf32>, vector<2x128xf32> -> vector<2x128xf32>
    %19 = arith.addf %16, %18 : vector<2x128xf32>
    %c0_15 = arith.constant 0 : index
    %c0_16 = arith.constant 0 : index
    %20 = vector.load %arg7[%c0_15, %c0_16] : memref<1x128xf32, #tpu.memory_space<vmem>>, vector<1x128xf32>
    %21 = vector.broadcast %20 : vector<1x128xf32> to vector<2x128xf32>
    %22 = arith.addf %19, %21 : vector<2x128xf32>
    %23 = vector.extract_strided_slice %22 {offsets = [0, 0], sizes = [2, 64], strides = [1, 1]} : vector<2x128xf32> to vector<2x64xf32>
    %24 = arith.negf %23 : vector<2x64xf32>
    %25 = math.exp %24 : vector<2x64xf32>
    %cst_17 = arith.constant 1.000000e+00 : f32
    %26 = vector.broadcast %cst_17 : f32 to vector<2x64xf32>
    %27 = arith.addf %26, %25 : vector<2x64xf32>
    %28 = arith.divf %26, %27 : vector<2x64xf32>
    %29 = vector.extract_strided_slice %28 {offsets = [0, 0], sizes = [2, 32], strides = [1, 1]} : vector<2x64xf32> to vector<2x32xf32>
    %30 = vector.extract_strided_slice %28 {offsets = [0, 32], sizes = [2, 32], strides = [1, 1]} : vector<2x64xf32> to vector<2x32xf32>
    %31 = vector.extract_strided_slice %22 {offsets = [0, 64], sizes = [2, 32], strides = [1, 1]} : vector<2x128xf32> to vector<2x32xf32>
    %32 = vector.extract_strided_slice %22 {offsets = [0, 96], sizes = [2, 32], strides = [1, 1]} : vector<2x128xf32> to vector<2x32xf32>
    %33 = arith.mulf %29, %32 : vector<2x32xf32>
    %34 = arith.addf %31, %33 : vector<2x32xf32>
    %35 = math.tanh %34 : vector<2x32xf32>
    %cst_18 = arith.constant 1.000000e+00 : f32
    %36 = vector.broadcast %cst_18 : f32 to vector<2x32xf32>
    %37 = arith.subf %36, %30 : vector<2x32xf32>
    %38 = arith.mulf %37, %35 : vector<2x32xf32>
    %39 = arith.mulf %30, %3 : vector<2x32xf32>
    %40 = arith.addf %38, %39 : vector<2x32xf32>
    %c0_19 = arith.constant 0 : index
    %c0_20 = arith.constant 0 : index
    %41 = vector.load %arg8[%c0_19, %c0_20] : memref<32x128xf32, #tpu.memory_space<vmem>>, vector<32x128xf32>
    %cst_21 = arith.constant dense<0.000000e+00> : vector<2x128xf32>
    %42 = tpu.matmul %40, %41, %cst_21 {dimension_numbers = #tpu.dot_dimension_numbers<[1], [0], [0], [1], [0, 0, 1, 1], [], []>} : vector<2x32xf32>, vector<32x128xf32>, vector<2x128xf32> -> vector<2x128xf32>
    %c0_22 = arith.constant 0 : index
    %c0_23 = arith.constant 0 : index
    %43 = vector.load %arg9[%c0_22, %c0_23] : memref<1x128xf32, #tpu.memory_space<vmem>>, vector<1x128xf32>
    %44 = vector.broadcast %43 : vector<1x128xf32> to vector<2x128xf32>
    %45 = arith.addf %42, %44 : vector<2x128xf32>
    %cst_24 = arith.constant dense<0xFF800000> : vector<2xf32>
    %46 = vector.multi_reduction <maximumf>, %45, %cst_24 [1] : vector<2x128xf32> to vector<2xf32>
    %47 = vector.shape_cast %46 : vector<2xf32> to vector<2x1xf32>
    %48 = vector.broadcast %47 : vector<2x1xf32> to vector<2x128xf32>
    %49 = arith.subf %45, %48 : vector<2x128xf32>
    %50 = math.exp %49 : vector<2x128xf32>
    %cst_25 = arith.constant dense<0.000000e+00> : vector<2xf32>
    %51 = vector.multi_reduction <add>, %50, %cst_25 [1] : vector<2x128xf32> to vector<2xf32>
    %52 = vector.shape_cast %51 : vector<2xf32> to vector<2x1xf32>
    %53 = math.log %52 : vector<2x1xf32>
    %54 = arith.addf %47, %53 : vector<2x1xf32>
    %55 = vector.broadcast %54 : vector<2x1xf32> to vector<2x128xf32>
    %56 = arith.subf %45, %55 : vector<2x128xf32>
    %c0_26 = arith.constant 0 : index
    %c0_27 = arith.constant 0 : index
    %c0_28 = arith.constant 0 : index
    %57 = vector.load %arg10[%c0_26, %c0_27, %c0_28] : memref<1x2x128xf32, #tpu.memory_space<vmem>>, vector<1x2x128xf32>
    %58 = vector.shape_cast %57 : vector<1x2x128xf32> to vector<2x128xf32>
    %59 = vector.shape_cast %56 : vector<2x128xf32> to vector<1x2x128xf32>
    tpu.vector_store %arg10[%c0_26, %c0_27, %c0_28], %59 {strides = array<i32>} : memref<1x2x128xf32, #tpu.memory_space<vmem>>, vector<1x2x128xf32>,
    %c0_29 = arith.constant 0 : index
    %c0_30 = arith.constant 0 : index
    %60 = vector.load %arg12[%c0_29, %c0_30] : memref<2x32xf32, #tpu.memory_space<vmem>>, vector<2x32xf32>
    tpu.vector_store %arg12[%c0_29, %c0_30], %40 {strides = array<i32>} : memref<2x32xf32, #tpu.memory_space<vmem>>, vector<2x32xf32>,
    %c3_i32 = arith.constant 3 : i32
    %61 = arith.cmpi eq, %arg0, %c3_i32 : i32
    %62 = arith.extui %61 : i1 to i32
    %c0_i32_31 = arith.constant 0 : i32
    %63 = arith.cmpi ne, %62, %c0_i32_31 : i32
    scf.if %63 {
      %c0_32 = arith.constant 0 : index
      %c0_33 = arith.constant 0 : index
      %64 = vector.load %arg11[%c0_32, %c0_33] : memref<2x32xf32, #tpu.memory_space<vmem>>, vector<2x32xf32>
      tpu.vector_store %arg11[%c0_32, %c0_33], %40 {strides = array<i32>} : memref<2x32xf32, #tpu.memory_space<vmem>>, vector<2x32xf32>,
    } else {
    }
    return
  }
  func.func @transform_0(%arg0: i32) -> (i32, i32, i32) {
    %c0_i32 = arith.constant 0 : i32
    %c0_i32_0 = arith.constant 0 : i32
    %c0_i32_1 = arith.constant 0 : i32
    return %arg0, %c0_i32, %c0_i32_0 : i32, i32, i32
  }
  func.func @transform_1(%arg0: i32) -> (i32, i32) {
    %c0_i32 = arith.constant 0 : i32
    %c0_i32_0 = arith.constant 0 : i32
    %c0_i32_1 = arith.constant 0 : i32
    return %c0_i32, %c0_i32_0 : i32, i32
  }
  func.func @transform_2(%arg0: i32) -> (i32, i32, i32) {
    %c0_i32 = arith.constant 0 : i32
    %c0_i32_0 = arith.constant 0 : i32
    %c0_i32_1 = arith.constant 0 : i32
    %c0_i32_2 = arith.constant 0 : i32
    return %c0_i32, %c0_i32_0, %c0_i32_1 : i32, i32, i32
  }
  func.func @transform_3(%arg0: i32) -> (i32, i32) {
    %c0_i32 = arith.constant 0 : i32
    %c0_i32_0 = arith.constant 0 : i32
    %c0_i32_1 = arith.constant 0 : i32
    return %c0_i32, %c0_i32_0 : i32, i32
  }
  func.func @transform_4(%arg0: i32) -> (i32, i32) {
    %c0_i32 = arith.constant 0 : i32
    %c0_i32_0 = arith.constant 0 : i32
    %c0_i32_1 = arith.constant 0 : i32
    return %c0_i32, %c0_i32_0 : i32, i32
  }
  func.func @transform_5(%arg0: i32) -> (i32, i32) {
    %c0_i32 = arith.constant 0 : i32
    %c0_i32_0 = arith.constant 0 : i32
    %c0_i32_1 = arith.constant 0 : i32
    return %c0_i32, %c0_i32_0 : i32, i32
  }
  func.func @transform_6(%arg0: i32) -> (i32, i32) {
    %c0_i32 = arith.constant 0 : i32
    %c0_i32_0 = arith.constant 0 : i32
    %c0_i32_1 = arith.constant 0 : i32
    return %c0_i32, %c0_i32_0 : i32, i32
  }
  func.func @transform_7(%arg0: i32) -> (i32, i32) {
    %c0_i32 = arith.constant 0 : i32
    %c0_i32_0 = arith.constant 0 : i32
    %c0_i32_1 = arith.constant 0 : i32
    return %c0_i32, %c0_i32_0 : i32, i32
  }
  func.func @transform_8(%arg0: i32) -> (i32, i32) {
    %c0_i32 = arith.constant 0 : i32
    %c0_i32_0 = arith.constant 0 : i32
    %c0_i32_1 = arith.constant 0 : i32
    return %c0_i32, %c0_i32_0 : i32, i32
  }
  func.func @transform_9(%arg0: i32) -> (i32, i32, i32) {
    %c0_i32 = arith.constant 0 : i32
    %c0_i32_0 = arith.constant 0 : i32
    %c0_i32_1 = arith.constant 0 : i32
    return %arg0, %c0_i32, %c0_i32_0 : i32, i32, i32
  }
  func.func @transform_10(%arg0: i32) -> (i32, i32) {
    %c0_i32 = arith.constant 0 : i32
    %c0_i32_0 = arith.constant 0 : i32
    %c0_i32_1 = arith.constant 0 : i32
    return %c0_i32, %c0_i32_0 : i32, i32
  }
}

</mosaic_0001>

<bundles_post_ra>
// kernel: generator_forward.1
= control target key start
LH: loop header
LB: loop body
LE: loop exit
PB: predicated region body
PF: predicated region fallthrough
CT: control target
= control target key end

     0   :  { %s1935_s0 = inlined_call_operand.vmem [shape: s32[4,2,1], index: 0, kind: input, shape index: {}]   ;;  %s1936_s1 = inlined_call_operand.vmem [shape: f32[2,64], index: 1, kind: input, shape index: {}]   ;;  %s1937_s2 = inlined_call_operand.vmem [shape: f32[1,2,32], index: 2, kind: input, shape index: {}]   ;;  %s1938_s3 = inlined_call_operand.hbm [shape: f32[128,128], index: 3, kind: input, shape index: {}]   ;;  %s1939_s4 = inlined_call_operand.hbm [shape: f32[64,128], index: 4, kind: input, shape index: {}]   ;;  %s1940_s5 = inlined_call_operand.hbm [shape: f32[32,128], index: 5, kind: input, shape index: {}]   ;;  %s1941_s6 = inlined_call_operand.hbm [shape: f32[1,128], index: 6, kind: input, shape index: {}]   ;;  %s1942_s7 = inlined_call_operand.vmem [shape: f32[32,128], index: 7, kind: input, shape index: {}]   ;;  %s1943_s8 = inlined_call_operand.hbm [shape: f32[1,128], index: 8, kind: input, shape index: {}]   ;;  %s1944_s9 = inlined_call_operand.hbm [shape: f32[4,2,128], index: 9, kind: output, shape index: {0}]   ;;  %s1945_s10 = inlined_call_operand.hbm [shape: f32[2,32], index: 10, kind: output, shape index: {1}]  }
   0x1   :  { %1956 = sst [smem:[#allocation26_spill]] %s1939_s4 }
   0x2   :  { %16 = vsyncpa [#allocation4], 0 }
   0x3   :  { %17 = vsyncpa [#allocation7], 0 }
   0x4   :  { %18 = vsyncpa [#allocation10], 0 }
   0x5   :  { %19 = vsyncpa [#allocation5], 0 }
   0x6   :  { %21 = vsyncpa [#allocation5 + $0x1], 0 }
   0x7   :  { %22 = vsyncpa [#allocation14], 0  ;;  %s1606_s13 = smov 0   ;;  %s1608_s14 = smov 0  }
   0x8   :  { %s1610_s15 = smov 0   ;;  %s1612_s16 = smov 0  }
   0x9 LB: > { %1957 = sst [smem:[#allocation20_spill]] %s1520_s13  ;;  %s1627_s17 = sadd.s32 4294967295, %s1532_s16   ;;  %s1532_s16 = sphi %s1612_s16, %s1987_s16   ;;  %s1528_s15 = sphi %s1610_s15, %s1989_s15   ;;  %s1524_s14 = sphi %s1608_s14, %s1991_s14   ;;  %s1520_s13 = sphi %s1606_s13, %s1990_s13  }
   0xa   : > { %1958 = sst [smem:[#allocation21_spill]] %s1528_s15  ;;  %s978_s18 = sadd.s32 4294967294, %s1532_s16  }
   0xb   : > { %1959 = sst [smem:[#allocation22_spill]] %s1532_s16  ;;  %s1631_s19 = sadd.s32 1, %s1532_s16  }
   0xc   : > { %1960 = sst [smem:[#allocation23_spill]] %s1631_s19  ;;  %s229_s20 = sadd.s32 1, %s1528_s15 }
   0xd   : > { %s226_s21 = ssub.s32 %s1532_s16, %s1631_s19  ;;  %p239_p0 = scmp.ne.s32.totalorder %s1528_s15, %s1524_s14 }
   0xe   : > { %p227_p1 = scmp.eq.s32.totalorder %s226_s21, 0  ;;  %p1947_p2 = scmp.eq.s32.totalorder %s1627_s17, 3 }
   0xf   : > { %p245_p3 = scmp.ne.s32.totalorder %s1524_s14, %s1520_s13  ;;  %p246_p4 = scmp.eq.s32.totalorder %s978_s18, 3 }
  0x10   : > { %s1642_s22 = scalar_select %p227_p1, %s1528_s15, %s229_s20  }
  0x11   : > { %p1646_p5 = por %p1947_p2, %p239_p0  ;;  %p1650_p6 = por %p246_p4, %p245_p3 }
  0x12   : > { %1961 = sst [smem:[#allocation24_spill]] %s1642_s22  ;;  %p979_p7 = scmp.ge.s32.totalorder %s1532_s16, 1 }
  0x13   : > { %s1962_s23 = scalar_select %p1646_p5, 1, 0 }
  0x14   : > { %s1963_s24 = scalar_select %p1650_p6, 1, 0 }
  0x15   : > { %p274_p8 = scmp.lt.s32.totalorder %s1532_s16, 5  ;;  %p1948_p10 = scmp.eq.s32.totalorder %s1627_s17, 0 }
  0x16   : > { %1964 = sst [smem:[#allocation25_spill]] %s1963_s24  ;;  %s1534_s26 = smov [#allocation6]  }
  0x17   : > { %p1658_p11 = pnand %p979_p7, %p274_p8  ;;  %s305_s27 = sshll.u32 %s1534_s26, 4  ;;  %s1664_s27 = int_to_ptr.vmem [resolvable:$true] %s305_s27 }
  0x18   : > { %s1535_s29 = smov [#allocation9]   ;;  %s1536_s11 = smov [#allocation3]  }
  0x19   : > { %s1965_s25 = scalar_select %p1658_p11, 1, 0 }
  0x1a   : > { %p1196_p12 = pneg %p1658_p11  ;;  %s332_s30 = sshll.u32 %s1535_s29, 4  ;;  %s1672_s30 = int_to_ptr.vmem [resolvable:$true] %s332_s30 }
  0x1b   : > { %s1674_s12 = sshll.u32 %s1536_s11, 4  ;;  %s1967_s4 = sld [smem:[#allocation26_spill]]  ;;  %s293_s12 = int_to_ptr.vmem [resolvable:$true] %s1674_s12 }
  0x1c   : > { %p1668_p13 = pnand %p1948_p10, %p1196_p12 }
  0x1e   : > { %p1684_p1 = pneg %p1668_p13 }
  0x21   : > { %s1288_s21 = scalar_lea.hbm %s1967_s4, 1024 }
  0x22   : > { %p1289_p0 = scmp.ne.s32.totalorder %s1967_s4, %s1288_s21  ;;  %p1295_p7 = scmp.lt.u32.totalorder %s1288_s21, %s1967_s4 }
  0x24   : > { %p1291_p3 = pnand %p1684_p1, %p1289_p0 }
  0x26   : > { %p1292_p4 = pneg %p1291_p3 }
  0x28   : > { %p1297_p8 = pnand %p1295_p7, %p1292_p4 }
  0x2a   : > { %1300 = shalt.err (!%p1297_p8)
}
  0x2b   : > { %s1301_s22 = scalar_lea.vmem %s1664_s27, 1024  ;;  %p1309_p10 = scmp.lt.s32.totalorder %s1664_s27, %s1664_s27 }
  0x2c   : > { %p1302_p12 = scmp.ne.s32.totalorder %s1664_s27, %s1301_s22  ;;  %p1310_p6 = scmp.lt.s32.totalorder %s1301_s22, %s1301_s22 }
  0x2e   : > { %p1304_p2 = pnand %p1302_p12, %p1684_p1  ;;  %p1311_p0 = por %p1310_p6, %p1309_p10 }
  0x30   : > { %p1305_p9 = pneg %p1304_p2 }
  0x32   : > { %p1312_p3 = pnand %p1311_p0, %p1305_p9 }
  0x34   : > { %1315 = shalt.err (!%p1312_p3)
}
  0x35   : > { %s1537_s18 = smov 128   ;;  %s1538_s20 = smov 8  }
  0x36   : > { %1202 = dma.hbm_to_vmem [thread:$0]  (!%p1668_p13), %s1967_s4, 1024, %s1664_s27, [#allocation7], %s1537_s18, %s1537_s18, %s1538_s20  }
  0x37   : > { %s1316_s22 = scalar_lea.hbm %s1941_s6, 16 }
  0x38   : > { %p1317_p2 = scmp.ne.s32.totalorder %s1941_s6, %s1316_s22  ;;  %p1323_p10 = scmp.lt.u32.totalorder %s1316_s22, %s1941_s6 }
  0x3a   : > { %p1319_p6 = pnand %p1317_p2, %p1684_p1 }
  0x3c   : > { %p1320_p9 = pneg %p1319_p6 }
  0x3e   : > { %p1325_p4 = pnand %p1323_p10, %p1320_p9 }
  0x40   : > { %1328 = shalt.err (!%p1325_p4)
}
  0x41   : > { %s1329_s27 = scalar_lea.vmem %s1672_s30, 16  ;;  %s1336_s19 = scalar_lea.vmem %s1672_s30, 32 }
  0x42   : > { %p1330_p7 = scmp.ne.s32.totalorder %s1672_s30, %s1329_s27  ;;  %p1337_p0 = scmp.lt.s32.totalorder %s1672_s30, %s1672_s30 }
  0x43   : > { %p1338_p3 = scmp.lt.s32.totalorder %s1336_s19, %s1329_s27 }
  0x44   : > { %p1332_p8 = pnand %p1330_p7, %p1684_p1 }
  0x45   : > { %p1339_p2 = por %p1338_p3, %p1337_p0 }
  0x46   : > { %p1333_p12 = pneg %p1332_p8 }
  0x48   : > { %p1340_p6 = pnand %p1339_p2, %p1333_p12 }
  0x4a   : > { %1343 = shalt.err (!%p1340_p6)
}
  0x4b   : > { %1208 = dma.hbm_to_vmem [thread:$0]  (!%p1668_p13), %s1941_s6, 16, %s1672_s30, [#allocation10]  }
  0x4c   : > { %s1344_s26 = scalar_lea.hbm %s1938_s3, 2048 }
  0x4d   : > { %p1345_p9 = scmp.ne.s32.totalorder %s1938_s3, %s1344_s26  ;;  %p1351_p7 = scmp.lt.u32.totalorder %s1344_s26, %s1938_s3 }
  0x4f   : > { %p1347_p10 = pnand %p1345_p9, %p1684_p1 }
  0x51   : > { %p1348_p4 = pneg %p1347_p10 }
  0x53   : > { %p1353_p8 = pnand %p1351_p7, %p1348_p4 }
  0x55   : > { %1356 = shalt.err (!%p1353_p8)
}
  0x56   : > { %s1357_s19 = scalar_lea.vmem %s293_s12, 2048  ;;  %p1365_p2 = scmp.lt.s32.totalorder %s293_s12, %s293_s12 }
  0x57   : > { %p1358_p12 = scmp.ne.s32.totalorder %s293_s12, %s1357_s19  ;;  %p1366_p6 = scmp.lt.s32.totalorder %s1357_s19, %s1357_s19 }
  0x59   : > { %p1360_p0 = pnand %p1358_p12, %p1684_p1  ;;  %p1367_p5 = por %p1366_p6, %p1365_p2 }
  0x5b   : > { %p1361_p3 = pneg %p1360_p0 }
  0x5d   : > { %p1368_p11 = pnand %p1367_p5, %p1361_p3 }
  0x5f   : > { %1371 = shalt.err (!%p1368_p11)
}
  0x60   : > { %1199 = dma.hbm_to_vmem [thread:$0]  (!%p1668_p13), %s1938_s3, 2048, %s293_s12, [#allocation4], %s1537_s18, %s1537_s18, %s1538_s20  }
  0x61   : > { %s1539_s16 = smov [#allocation8]   ;;  %s1540_s21 = smov [#allocation11]  }
  0x62   : > { %s318_s24 = sshll.u32 %s1539_s16, 4  ;;  %s346_s26 = sshll.u32 %s1540_s21, 4  ;;  %s319_s24 = int_to_ptr.vmem [resolvable:$true] %s318_s24  ;;  %s347_s26 = int_to_ptr.vmem [resolvable:$true] %s346_s26 }
  0x63   : > { %s1372_s22 = scalar_lea.hbm %s1940_s5, 512 }
  0x64   : > { %p1373_p5 = scmp.ne.s32.totalorder %s1940_s5, %s1372_s22  ;;  %p1379_p10 = scmp.lt.u32.totalorder %s1372_s22, %s1940_s5 }
  0x66   : > { %p1375_p11 = pnand %p1373_p5, %p1684_p1 }
  0x68   : > { %p1376_p9 = pneg %p1375_p11 }
  0x6a   : > { %p1381_p4 = pnand %p1379_p10, %p1376_p9 }
  0x6c   : > { %1384 = shalt.err (!%p1381_p4)
}
  0x6d   : > { %s1385_s12 = scalar_lea.vmem %s319_s24, 512  ;;  %p1393_p0 = scmp.lt.s32.totalorder %s319_s24, %s319_s24 }
  0x6e   : > { %p1386_p7 = scmp.ne.s32.totalorder %s319_s24, %s1385_s12  ;;  %p1394_p3 = scmp.lt.s32.totalorder %s1385_s12, %s1385_s12 }
  0x70   : > { %p1388_p8 = pnand %p1386_p7, %p1684_p1  ;;  %p1395_p2 = por %p1394_p3, %p1393_p0 }
  0x72   : > { %p1389_p12 = pneg %p1388_p8 }
  0x74   : > { %p1396_p6 = pnand %p1395_p2, %p1389_p12 }
  0x76   : > { %1399 = shalt.err (!%p1396_p6)
}
  0x77   : > { %1205 = dma.hbm_to_vmem [thread:$0]  (!%p1668_p13), %s1940_s5, 512, %s319_s24, [#allocation7], %s1537_s18, %s1537_s18, %s1538_s20  }
  0x78   : > { %s1400_s29 = scalar_lea.hbm %s1943_s8, 16 }
  0x79   : > { %p1401_p5 = scmp.ne.s32.totalorder %s1943_s8, %s1400_s29  ;;  %p1407_p10 = scmp.lt.u32.totalorder %s1400_s29, %s1943_s8 }
  0x7b   : > { %p1403_p11 = pnand %p1401_p5, %p1684_p1 }
  0x7d   : > { %p1404_p9 = pneg %p1403_p11 }
  0x7f   : > { %p1409_p4 = pnand %p1407_p10, %p1404_p9 }
  0x81   : > { %1412 = shalt.err (!%p1409_p4)
}
  0x82   : > { %s1413_s30 = scalar_lea.vmem %s347_s26, 16  ;;  %s1420_s18 = scalar_lea.vmem %s347_s26, 32 }
  0x83   : > { %p1414_p7 = scmp.ne.s32.totalorder %s347_s26, %s1413_s30  ;;  %p1421_p0 = scmp.lt.s32.totalorder %s347_s26, %s347_s26 }
  0x84   : > { %p1422_p3 = scmp.lt.s32.totalorder %s1420_s18, %s1413_s30 }
  0x85   : > { %p1416_p8 = pnand %p1414_p7, %p1684_p1 }
  0x86   : > { %p1423_p2 = por %p1422_p3, %p1421_p0 }
  0x87   : > { %p1417_p12 = pneg %p1416_p8 }
  0x89   : > { %p1424_p6 = pnand %p1423_p2, %p1417_p12 }
  0x8b   : > { %1427 = shalt.err (!%p1424_p6)
}
  0x8c   : > { %1211 = dma.hbm_to_vmem [thread:$0]  (!%p1668_p13), %s1943_s8, 16, %s347_s26, [#allocation10]  }
  0x8d   : > { %p1969_p5 = scmp.ne.s32.totalorder %s1965_s25, 0 }
  0x8e   : > { %p1970_p11 = scmp.eq.s32.totalorder (!%p1969_p5), %s1627_s17, 0 }
  0x8f   : > { %366 = sbr.rel (%p1969_p5) target bundleno = 1583 (0x62f), region = 56 }
  0x96   : > { %1499 = dma.done.wait (%p1970_p11), [#allocation4], 2048   ;;  %p1971_p1 = pmov %p1970_p11 }
  0x98   : > { %1501 = vsyncadd (%p1971_p1), [#allocation4], 4294965248  ;;  %p1972_p9 = pmov %p1971_p1 }
  0x99   : > { %p1973_p10 = pmov %p1971_p1 }
  0x9a   : > { %1503 = dma.done.wait (%p1972_p9), [#allocation7], 1536  }
  0x9b   : > { %1505 = vsyncadd (%p1973_p10), [#allocation7], 4294965760  ;;  %p1974_p4 = pmov %p1971_p1 }
  0x9c   : > { %p1975_p13 = pmov %p1971_p1 }
  0x9d   : > { %1507 = dma.done.wait (%p1974_p4), [#allocation10], 32  }
  0x9e   : > { %1509 = vsyncadd (%p1975_p13), [#allocation10], 4294967264  ;;  %s414_s15 = sand.u32 1, %s1524_s14   ;;  %p419_p7 = scmp.lt.s32.totalorder %s1627_s17, 3 }
  0x9f   : > { %s1811_s25 = sshll.u32 %s414_s15, 1  ;;  %p1976_p8 = scmp.ne.s32.totalorder %s1627_s17, 0 }
  0xa0   : > { %s420_s28 = scalar_select %p419_p7, %s1627_s17, 3 }
  0xa1   : > { %s416_s16 = scalar_lea.vmem [#allocation12], %s1811_s25  ;;  %426 = sbr.rel (%p1976_p8) target bundleno = 168 (0xa8), region = 80  ;;  %v427_v0 = vld [vmem:[%s1937_s2] sm:$0x3] (!%p1976_p8)  ;;  %vm428_vm0 = vcmask (!%p1976_p8), 254976  }
  0xa2   : > { %s993_s26 = sshll.u32 %s420_s28, 1  ;;  %429 = vst.msk [vmem:[#allocation2] sm:$0x3] (!%p1976_p8), %vm428_vm0, %v427_v0 }
  0xa3   : > { %s422_s13 = scalar_lea.vmem %s1935_s0, %s993_s26 }
  0xa8 PF: > { %v431_v1 = vld [vmem:[%s422_s13] sm:$0x3]  ;;  %v440_v2 = vld [vmem:[#allocation3] sm:$0xff]  ;;  %v441_v3 = vld [vmem:[#allocation3 + $0x8] sm:$0xff]  ;;  %v1541_v4 = vmov 0   ;;  %v1542_v5 = vmov 0.0|0.0   ;;  %v432_v49 = vlaneseq }
  0xa9   : > { %1277 = vset.pattern.permute.xlu0 %v1541_v4  ;;  %1134 = vmatprep.subr.bf16.mxu1 %v1542_v5  ;;  %v1135_v6 = vpack.c.bf16 %v441_v3, %v440_v2  ;;  %v442_v7 = vld [vmem:[#allocation3 + $0x10] sm:$0xff]  ;;  %v443_v8 = vld [vmem:[#allocation3 + $0x18] sm:$0xff]  ;;  %v457_v9 = vld [vmem:[#allocation6] sm:$0xff]  ;;  %vm1543_vm1 = vmmov 0   ;;  %v1544_v14 = vmov 0.0   ;;  %vm465_vm2 = vcmask 523264  }
  0xaa   : > { %435 = vperm.xlu0 %1277, %v431_v1   ;;  %1122 = vmatprep.subr.bf16.mxu0 %v1542_v5  ;;  %v458_v10 = vld [vmem:[#allocation6 + $0x8] sm:$0xff]  ;;  %v1138_v11 = vpack.c.bf16 %v443_v8, %v442_v7  ;;  %v459_v13 = vld [vmem:[#allocation6 + $0x10] sm:$0xff]  ;;  %v444_v15 = vld [vmem:[#allocation3 + $0x20] sm:$0xff]  ;;  %vm613_vm3 = vcmask 261120   ;;  %v433_v50 = vand.u32 127, %v432_v49  ;;  %v1545_v52 = vmov 1.0  }
  0xab   : > { %1136 = vmatpush3.bf16.msra.mxu1 %v1135_v6  ;;  %v1123_v12 = vpack.c.bf16 %v458_v10, %v457_v9  ;;  %1062 = vmatprep.mubr.msk.f32.mxu0 %vm1543_vm1, %v1544_v14  ;;  %v445_v16 = vld [vmem:[#allocation3 + $0x28] sm:$0xff]  ;;  %v460_v17 = vld [vmem:[#allocation6 + $0x18] sm:$0xff]  ;;  %v461_v19 = vld [vmem:[#allocation6 + $0x20] sm:$0xff]  ;;  %s1546_s27 = smov 32   ;;  %s1547_s19 = smov 64   ;;  %vm826_vm5 = vcmask 254976  }
  0xac   : > { %1137 = vmatprep.subr.bf16.mxu1 %v1542_v5  ;;  %1097 = vmatprep.mubr.msk.f32.mxu1 %vm1543_vm1, %v1544_v14  ;;  %v1126_v18 = vpack.c.bf16 %v460_v17, %v459_v13  ;;  %v462_v20 = vld [vmem:[#allocation6 + $0x28] sm:$0xff]  ;;  %v1141_v21 = vpack.c.bf16 %v445_v16, %v444_v15  ;;  %v446_v22 = vld [vmem:[#allocation3 + $0x30] sm:$0xff]  ;;  %v447_v23 = vld [vmem:[#allocation3 + $0x38] sm:$0xff]  ;;  %s1548_s13 = smov 96   ;;  %vm810_vm6 = vcmask 1041408   ;;  %p1003_p12 = scmp.ne.s32.totalorder %s1627_s17, 3 }
  0xad   : > { %1124 = vmatpush3.bf16.msra.mxu0 %v1123_v12  ;;  %v1129_v24 = vpack.c.bf16 %v462_v20, %v461_v19  ;;  %v463_v25 = vld [vmem:[#allocation6 + $0x30] sm:$0xff]  ;;  %v464_v26 = vld [vmem:[#allocation6 + $0x38] sm:$0xff]  ;;  %v1144_v27 = vpack.c.bf16 %v447_v23, %v446_v22  ;;  %v448_v28 = vld [vmem:[#allocation3 + $0x40] sm:$0xff] }
  0xae   : > { %1125 = vmatprep.subr.bf16.mxu0 %v1542_v5  ;;  %v449_v29 = vld [vmem:[#allocation3 + $0x48] sm:$0xff]  ;;  %v1132_v30 = vpack.c.bf16 %v464_v26, %v463_v25  ;;  %v609_v31 = vld [vmem:[#allocation8] sm:$0xff]  ;;  %v450_v34 = vld [vmem:[#allocation3 + $0x50] sm:$0xff] }
  0xaf   : > { %1139 = vmatpush3.bf16.msra.mxu1 %v1138_v11  ;;  %v610_v32 = vld [vmem:[#allocation8 + $0x8] sm:$0xff]  ;;  %v1147_v33 = vpack.c.bf16 %v449_v29, %v448_v28  ;;  %v451_v35 = vld [vmem:[#allocation3 + $0x58] sm:$0xff]  ;;  %v611_v38 = vld [vmem:[#allocation8 + $0x10] sm:$0xff] }
  0xb0   : > { %1140 = vmatprep.subr.bf16.mxu1 %v1542_v5  ;;  %v456_v36 = vld [vmem:[%s1936_s1] sm:$0x3]  ;;  %v1159_v37 = vpack.c.bf16 %v610_v32, %v609_v31  ;;  %v1150_v40 = vpack.c.bf16 %v451_v35, %v450_v34  ;;  %v452_v41 = vld [vmem:[#allocation3 + $0x60] sm:$0xff]  ;;  %v453_v42 = vld [vmem:[#allocation3 + $0x68] sm:$0xff] }
  0xb1   : > { %1127 = vmatpush3.bf16.msra.mxu0 %v1126_v18  ;;  %v612_v39 = vld [vmem:[#allocation8 + $0x18] sm:$0xff]  ;;  %v1153_v44 = vpack.c.bf16 %v453_v42, %v452_v41  ;;  %v454_v45 = vld [vmem:[#allocation3 + $0x70] sm:$0xff]  ;;  %v999_v60 = vld [vmem:[#allocation9] ss:$0 sm:$0xff] }
  0xb2   : > { %1128 = vmatprep.subr.bf16.mxu0 %v1542_v5  ;;  %v1162_v43 = vpack.c.bf16 %v612_v39, %v611_v38  ;;  %v455_v46 = vld [vmem:[#allocation3 + $0x78] sm:$0xff]  ;;  %v725_v9 = vld [vmem:[%s1942_s7 + $0x8] sm:$0xff]  ;;  %v726_v10 = vld [vmem:[%s1942_s7 + $0x10] sm:$0xff] }
  0xb3   : > { %1142 = vmatpush3.bf16.msra.mxu1 %v1141_v21  ;;  %v430_v47 = vld [vmem:[#allocation2] sm:$0x3]  ;;  %v1156_v48 = vpack.c.bf16 %v455_v46, %v454_v45  ;;  %v727_v12 = vld [vmem:[%s1942_s7 + $0x18] sm:$0xff]  ;;  %v1001_v22 = vld [vmem:[#allocation11] ss:$0 sm:$0xff] }
  0xb4   : > { %1143 = vmatprep.subr.bf16.mxu1 %v1542_v5  ;;  %v724_v8 = vld [vmem:[%s1942_s7] sm:$0xff]  ;;  %v1168_v13 = vpack.c.bf16 %v727_v12, %v726_v10 }
  0xb5   : > { %1130 = vmatpush3.bf16.msra.mxu0 %v1129_v24  ;;  %v1165_v11 = vpack.c.bf16 %v725_v9, %v724_v8 }
  0xb6   : > { %1131 = vmatprep.subr.bf16.mxu0 %v1542_v5 }
  0xb7   : > { %1145 = vmatpush3.bf16.msra.mxu1 %v1144_v27 }
  0xb8   : > { %1146 = vmatprep.subr.bf16.mxu1 %v1542_v5 }
  0xb9   : > { %1133 = vmatpush3.bf16.msra.mxu0 %v1132_v30 }
  0xba   : > { %1158 = vmatprep.subr.bf16.mxu0 %v1542_v5 }
  0xbb   : > { %1148 = vmatpush3.bf16.msra.mxu1 %v1147_v33 }
  0xbc   : > { %1149 = vmatprep.subr.bf16.mxu1 %v1542_v5  ;;  %1063 = vmatmul.mubr.msk.f32.vlgmr.msra.gmra.mrb[0].mxu0 %vm465_vm2, %v456_v36 }
  0xbd   : > { %1160 = vmatpush3.bf16.msra.mxu0 %v1159_v37  ;;  %1108 = vmatprep.mubr.msk.f32.mxu0 %vm1543_vm1, %v1544_v14 }
  0xbe   : > { %1161 = vmatprep.subr.bf16.mxu0 %v1542_v5 }
  0xbf   : > { %1151 = vmatpush3.bf16.msra.mxu1 %v1150_v40 }
  0xc0   : > { %1152 = vmatprep.subr.bf16.mxu1 %v1542_v5 }
  0xc1   : > { %1163 = vmatpush3.bf16.msra.mxu0 %v1162_v43 }
  0xc2   : > { %1164 = vmatprep.subr.bf16.mxu0 %v1542_v5 }
  0xc3   : > { %1154 = vmatpush3.bf16.msra.mxu1 %v1153_v44 }
  0xc4   : > { %1155 = vmatprep.subr.bf16.mxu1 %v1542_v5  ;;  %1109 = vmatmul.mubr.msk.f32.vlgmr.msra.gmra.mrb[2].mxu0 %vm613_vm3, %v430_v47 }
  0xc5   : > { %1119 = vmatprep.mubr.msk.f32.mxu0 %vm1543_vm1, %v1544_v14  ;;  %1166 = vmatpush3.bf16.msra.mxu0 %v1165_v11 }
  0xc6   : > { %1167 = vmatprep.subr.bf16.mxu0 %v1542_v5 }
  0xc7   : > { %1157 = vmatpush3.bf16.msra.mxu1 %v1156_v48 }
  0xc9   : > { %1169 = vmatpush3.bf16.msra.mxu0 %v1168_v13 }
 0x129   : > { %v436_v51 = vpop.permute.xlu0 %435 }
 0x12a   : > { %vm437_vm4 = vcmp.eq.s32.totalorder %v433_v50, %v436_v51 }
 0x12b   : > { %1098 = vmatmul.mubr.msk.f32.vlgmr.msra.gmra.mrb[0].mxu1 %vm437_vm4, %v1545_v52 }
 0x18f   : > { %v535_v53 = vpop.f32.mrb[0].mxu0 }
 0x190   : > { %v1064_v54 = vpop.f32.mrb[1].mxu0 }
 0x197   : > { %v683_v55 = vpop.f32.mrb[2].mxu0 }
 0x198   : > { %v1110_v56 = vpop.f32.mrb[3].mxu0 }
 0x1fe   : > { %v605_v57 = vpop.f32.mrb[0].mxu1 }
 0x1ff   : > { %v606_v58 = vadd.f32 %v605_v57, %v535_v53  ;;  %v1099_v59 = vpop.f32.mrb[1].mxu1 }
 0x201   : > { %v687_v61 = vadd.f32 %v683_v55, %v606_v58 }
 0x203   : > { %v695_v62 = vadd.f32 %v999_v60, %v687_v61 }
 0x205   : > { %703 = vrot.lane.b32.xlu0 %v695_v62, %s1546_s27  ;;  %v1000_v63 = vmul.f32 -1.442695, %v695_v62 }
 0x207   : > { %1278 = vpow2.f32 %v1000_v63 }
 0x209   : > { %719 = vrot.lane.b32.xlu0 %v430_v47, %s1546_s27 }
 0x211   : > { %v1279_v0 = vpop.eup %1278 }
 0x212   : > { %v699_v1 = vadd.f32 1.0, %v1279_v0 }
 0x214   : > { %1280 = vrcp.f32 %v699_v1 }
 0x21e   : > { %v1281_v2 = vpop.eup %1280 }
 0x21f   : > { %v713_v16 = vsub.f32 1.0, %v1281_v2 }
 0x277   : > { %v704_v3 = vpop.permute.xlu0 %703 }
 0x278   : > { %v706_v4 = vmul.f32 %v1281_v2, %v704_v3 }
 0x27a   : > { %708 = vrot.lane.b32.xlu1 %v706_v4, %s1547_s19 }
 0x27b   : > { %v720_v15 = vpop.permute.xlu0 %719 }
 0x27c   : > { %v722_v18 = vmul.f32 %v1281_v2, %v720_v15 }
 0x2ec   : > { %v709_v6 = vpop.permute.xlu1 %708 }
 0x2ed   : > { %v711_v7 = vadd.f32 %v709_v6, %v695_v62 }
 0x2ef   : > { %1282 = vtanh.f32 %v711_v7 }
 0x2f9   : > { %v1283_v14 = vpop.eup %1282 }
 0x2fa   : > { %715 = vrot.lane.b32.xlu1 %v1283_v14, %s1548_s13 }
 0x36c   : > { %v716_v17 = vpop.permute.xlu1 %715 }
 0x36d   : > { %v718_v19 = vmul.f32 %v716_v17, %v713_v16 }
 0x36f   : > { %v723_v20 = vadd.f32 %v722_v18, %v718_v19 }
 0x371   : > { %736 = vrot.lane.b32.xlu1 %v723_v20, %s1548_s13 }
 0x3e3   : > { %v737_v21 = vpop.permute.xlu1 %736 }
 0x3e4   : > { %827 = vst.msk [vmem:[#allocation2] sm:$0x3] %vm826_vm5, %v737_v21  ;;  %1120 = vmatmul.mubr.msk.f32.vlgmr.msra.gmra.mrb[4].mxu0 %vm613_vm3, %v737_v21  ;;  %832 = vst.msk [vmem:[#allocation13] sm:$0x3] (!%p1003_p12), %vm826_vm5, %v737_v21 }
 0x4b7   : > { %v806_v23 = vpop.f32.mrb[4].mxu0 }
 0x4b8   : > { %v807_v5 = vadd.f32 %v1001_v22, %v806_v23  ;;  %v1121_v24 = vpop.f32.mrb[5].mxu0 }
 0x4ba   : > { %v811_v25 = vsel %vm810_vm6, %v807_v5, -inf }
 0x4bb   : > { %812 = vmax.xlane.f32.xlu0 %v811_v25 }
 0x548   : > { %v813_v26 = vpop.xlane.xlu0 %812 }
 0x549   : > { %v814_v27 = vsub.f32 %v807_v5, %v813_v26 }
 0x54b   : > { %v815_v28 = vmul.f32 1.442695, %v814_v27 }
 0x54d   : > { %1284 = vpow2.f32 %v815_v28 }
 0x557   : > { %v1285_v29 = vpop.eup %1284 }
 0x558   : > { %v817_v30 = vsel %vm810_vm6, %v1285_v29, 0.0 }
 0x559   : > { %818 = vadd.xlane.f32.xlu1 %v817_v30 }
 0x5e6   : > { %v819_v31 = vpop.xlane.xlu1 %818 }
 0x5e7   : > { %1286 = vlog2.f32 %v819_v31 }
 0x5f1   : > { %v1287_v32 = vpop.eup %1286 }
 0x5f2   : > { %v821_v33 = vmul.f32 0.6931472, %v1287_v32  ;;  %831 = sbr.rel (%p1003_p12) target bundleno = 1529 (0x5f9), region = 84 }
 0x5f4   : > { %v822_v34 = vadd.f32 %v821_v33, %v813_v26 }
 0x5f6   : > { %v823_v35 = vsub.f32 %v807_v5, %v822_v34 }
 0x5f8   : > { %824 = vst [vmem:[%s416_s16] sm:$0x3] %v823_v35 }
 0x5f9 PF: > { %s1005_s21 = sshll.u32 %s1627_s17, 5  ;;  %s847_s27 = sshll.u32 %s416_s16, 4  ;;  %s848_s27 = int_to_ptr.vmem [resolvable:$true] %s847_s27 }
 0x5fa   : > { %s1873_s22 = scalar_lea.hbm %s1944_s9, %s1005_s21  ;;  %s834_s19 = scalar_lea.sflag [#allocation5], %s414_s15 }
 0x5fb   : > { %s1428_s30 = scalar_lea.vmem %s848_s27, 32  ;;  %p1977_p3 = scmp.ne.s32.totalorder %s1962_s23, 0 }
 0x5fc   : > { %p1429_p0 = scmp.ne.s32.totalorder %s848_s27, %s1428_s30  ;;  %s1549_s18 = smov [#allocation12]  }
 0x5fd   : > { %s1432_s20 = sshll.u32 %s1549_s18, 4  ;;  %s1433_s20 = int_to_ptr.vmem [resolvable:$false] %s1432_s20 }
 0x5fe   : > { %p1430_p2 = pnand %p1429_p0, %p1977_p3  ;;  %s1434_s24 = scalar_lea.vmem %s1433_s20, 64 }
 0x5ff   : > { %p1435_p5 = scmp.lt.s32.totalorder %s848_s27, %s1433_s20  ;;  %p1436_p11 = scmp.lt.s32.totalorder %s1434_s24, %s1428_s30 }
 0x600   : > { %p1431_p6 = pneg %p1430_p2 }
 0x601   : > { %p1437_p1 = por %p1436_p11, %p1435_p5 }
 0x603   : > { %p1438_p9 = pnand %p1437_p1, %p1431_p6 }
 0x605   : > { %1441 = shalt.err (!%p1438_p9)
}
 0x606   : > { %s1442_s15 = scalar_lea.hbm %s1873_s22, 32  ;;  %s1446_s28 = scalar_lea.hbm %s1944_s9, 128 }
 0x607   : > { %p1443_p10 = scmp.ne.s32.totalorder %s1873_s22, %s1442_s15  ;;  %p1447_p7 = scmp.lt.u32.totalorder %s1873_s22, %s1944_s9 }
 0x608   : > { %p1448_p8 = scmp.lt.u32.totalorder %s1446_s28, %s1442_s15  ;;  %p1450_p0 = scmp.lt.u32.totalorder %s1442_s15, %s1873_s22 }
 0x609   : > { %p1444_p4 = pnand %p1443_p10, %p1977_p3 }
 0x60a   : > { %p1449_p12 = por %p1448_p8, %p1447_p7 }
 0x60b   : > { %p1445_p13 = pneg %p1444_p4 }
 0x60c   : > { %p1451_p2 = por %p1450_p0, %p1449_p12 }
 0x60e   : > { %p1452_p6 = pnand %p1451_p2, %p1445_p13 }
 0x610   : > { %1455 = shalt.err (!%p1452_p6)
}
 0x611   : > { %1190 = dma.vmem_to_hbm [thread:$0]  (%p1977_p3), %s848_s27, 32, %s1873_s22, %s834_s19  }
 0x612   : > { %s1550_s4 = smov [#allocation13]   ;;  %p1978_p11 = scmp.eq.s32.totalorder %s1627_s17, 3 }
 0x613   : > { %s858_s13 = sshll.u32 %s1550_s4, 4  ;;  %s859_s13 = int_to_ptr.vmem [resolvable:$true] %s858_s13 }
 0x614   : > { %s1456_s21 = scalar_lea.vmem %s859_s13, 32  ;;  %p1463_p10 = scmp.lt.s32.totalorder %s859_s13, %s859_s13 }
 0x615   : > { %p1457_p5 = scmp.ne.s32.totalorder %s859_s13, %s1456_s21  ;;  %p1464_p4 = scmp.lt.s32.totalorder %s1456_s21, %s1456_s21 }
 0x617   : > { %p1458_p1 = pnand %p1457_p5, %p1978_p11  ;;  %p1465_p7 = por %p1464_p4, %p1463_p10 }
 0x619   : > { %p1459_p9 = pneg %p1458_p1 }
 0x61b   : > { %p1466_p8 = pnand %p1465_p7, %p1459_p9 }
 0x61d   : > { %1469 = shalt.err (!%p1466_p8)
}
 0x61e   : > { %s1470_s23 = scalar_lea.hbm %s1945_s10, 32  ;;  %p1979_p13 = pmov %p1978_p11 }
 0x61f   : > { %p1471_p3 = scmp.ne.s32.totalorder %s1945_s10, %s1470_s23  ;;  %p1476_p2 = scmp.lt.u32.totalorder %s1470_s23, %s1945_s10 }
 0x621   : > { %p1472_p12 = pnand %p1471_p3, %p1979_p13 }
 0x623   : > { %p1473_p0 = pneg %p1472_p12 }
 0x625   : > { %p1478_p6 = pnand %p1476_p2, %p1473_p0 }
 0x627   : > { %1481 = shalt.err (!%p1478_p6)
}
 0x628   : > { %p1980_p5 = pmov %p1978_p11 }
 0x62a   : > { %1192 = dma.vmem_to_hbm [thread:$0]  (%p1980_p5), %s859_s13, 32, %s1945_s10, [#allocation14]  }
 0x62b   : > { %p1981_p11 = pmov %p1980_p5 }
 0x62c   : > { %p1982_p1 = pmov %p1980_p5 }
 0x62d   : > { %1511 = dma.done.wait (%p1981_p11), [#allocation14], 32  }
 0x62e   : > { %1513 = vsyncadd (%p1982_p1), [#allocation14], 4294967264 }
 0x62f PF: > { %s1983_s24 = sld [smem:[#allocation22_spill]]  ;;  %s1984_s15 = sld [smem:[#allocation20_spill]] }
 0x630   : > { %s1985_s25 = sld [smem:[#allocation25_spill]] }
 0x635   : > { %p1228_p9 = scmp.ge.s32.totalorder %s1983_s24, 2  ;;  %s874_s16 = sand.u32 1, %s1984_s15  }
 0x636   : > { %p1986_p10 = scmp.ne.s32.totalorder %s1985_s25, 0  ;;  %s875_s28 = scalar_lea.sflag [#allocation5], %s874_s16 }
 0x638   : > { %p1213_p4 = pnand %p1228_p9, %p1986_p10 }
 0x63a   : > { %1515 = dma.done.wait (!%p1213_p4), %s875_s28, 32  }
 0x63b   : > { %1517 = vsyncadd (!%p1213_p4), %s875_s28, 4294967264  ;;  %s1987_s16 = sld [smem:[#allocation23_spill]]  ;;  %s1988_s26 = sld [smem:[#allocation21_spill]] }
 0x63c   : > { %s1989_s15 = sld [smem:[#allocation24_spill]]  ;;  %s1990_s13 = smov %s1524_s14 }
 0x641   : > { %p25_p7 = scmp.ge.s32.totalorder %s1987_s16, 6   ;;  %s1991_s14 = smov %s1988_s26 }
 0x643   :  { %27 = sbr.rel (!%p25_p7) target bundleno = 9 (0x9), region = 128 }
 0x64a   :  { %880 = vsyncpa [#allocation4], 1 }
 0x64b   :  { %882 = vsyncpa [#allocation4 + $0x1], 1 }
 0x64c   :  { %883 = vsyncpa [#allocation7], 1 }
 0x64d   :  { %884 = vsyncpa [#allocation10], 1 }
 0x64e   :  { %885 = vsyncpa [#allocation5], 1 }
 0x64f   :  { %887 = vsyncpa [#allocation5 + $0x1], 1 }
 0x650   :  { %888 = vsyncpa [#allocation14], 1 }

</bundles_post_ra>
